<compile_context>
chip_gen: v5e
topology: v5e:2x2
jax: 0.10.0
libtpu: 0.0.40
codegen_flags: <defaults>
</compile_context>

<pallas_src>
import math
import numpy as np
import jax
import jax.numpy as jnp
from jax.experimental import pallas as pl
from jax.experimental.pallas import tpu as pltpu

HEADS = 4
NEG_SLOPE = 0.2   # GATConv default leaky_relu negative slope
RATIO = 0.8


def sag_score_kernel(adj_ref, xwh_ref, asrc_ref, adst_ref, small_ref,
                     score_ref, gat_ref):
    # adj_ref:   [tq, N] int8   adj[i, j] = 1 iff edge j -> i (self loops included)
    # xwh_ref:   [H, N, C] bf16 hoisted projection x @ W, reshaped per head
    # asrc_ref:  [H, 1, N] f32  per-head source logits (lane-wise layout)
    # adst_ref:  [H, tq, 1] f32 per-head target logits for this row tile
    # small_ref: [H, 3, C] f32  row0 = GAT bias, row1 = lin_w, row2[0,0,0] = lin_b
    # score_ref: [1, tq] f32    lane-dense score output
    # gat_ref:   [H, tq, C] f32 VMEM scratch (per-head attention outputs)
    num_heads = xwh_ref.shape[0]
    neg_big = jnp.float32(-1e30)

    # Edge mask straight from int8, computed once per tile (no f32 convert).
    mask = adj_ref[...] != 0

    def head_body(h, carry):
        e = adst_ref[h] + asrc_ref[h]                        # [tq, N]
        e = jnp.where(e > 0, e, NEG_SLOPE * e)               # leaky_relu
        e = jnp.where(mask, e, neg_big)                      # mask non-edges
        e = e - jnp.max(e, axis=-1, keepdims=True)           # self loops => row max valid
        p = jnp.exp(e)                                       # unnormalized, in (0, 1]
        denom = jnp.sum(p, axis=-1, keepdims=True)           # [tq, 1]
        o = jnp.dot(p.astype(jnp.bfloat16), xwh_ref[h],
                    preferred_element_type=jnp.float32)      # [tq, C]
        # Deferred softmax normalization: scale the [tq, C] result, not [tq, N].
        gat_ref[h] = o * pl.reciprocal(denom, approx=True)
        return carry

    jax.lax.fori_loop(0, num_heads, head_body, 0)

    small = small_ref[...]                                   # [H, 3, C]
    bias = small[:, 0:1, :]
    linw = small[:, 1:2, :]
    linb = small[:, 2:3, :]                                  # lin_b at [0,0,0], zeros elsewhere
    g = gat_ref[...] + bias                                  # [H, tq, C]
    # ELU; clamp the exp argument so the discarded branch never produces inf.
    g = jnp.where(g > 0.0, g, jnp.exp(jnp.minimum(g, 0.0)) - 1.0)
    # Final 1-wide linear as a VPU/XLU reduce; the linb row adds lin_b exactly once.
    per = jnp.sum(g * linw + linb, axis=-1, keepdims=True)   # [H, tq, 1]
    s = jnp.sum(per, axis=0)                                 # [tq, 1]
    score_ref[...] = jnp.transpose(jnp.tanh(s))              # [1, tq] lane-dense store


def init_params(key, in_channels, heads=HEADS):
    F = in_channels
    C = in_channels          # out_channels == in_channels in SAGPooling.__init__
    k1, k2, k3, k4, k5 = jax.random.split(key, 5)
    scale_w = 1.0 / math.sqrt(F)
    scale_a = 1.0 / math.sqrt(C)
    scale_l = 1.0 / math.sqrt(heads * C)
    return {
        "w":       jax.random.normal(k1, (F, heads * C), jnp.float32) * scale_w,
        "att_dst": jax.random.normal(k2, (heads, C), jnp.float32) * scale_a,
        "att_src": jax.random.normal(k3, (heads, C), jnp.float32) * scale_a,
        "bias":    jnp.zeros((1, heads * C), jnp.float32),
        "lin_w":   jax.random.normal(k4, (heads * C, 1), jnp.float32) * scale_l,
        "lin_b":   jax.random.normal(k5, (1, 1), jnp.float32) * scale_l,
    }


def _vmem_limit_bytes():
    # Generation-aware scoped-VMEM limit: ~3/4 of physical per-core VMEM,
    # capped at 96 MiB (v7x: 64 MiB physical -> 48 MiB; v5e/v6e: 128 -> 96 MiB).
    cap = None
    try:
        cap = pltpu.get_tpu_info().vmem_capacity_bytes
    except Exception:
        cap = None
    if not cap:
        cap = 128 * 1024 * 1024
    return int(min(cap * 3 // 4, 96 * 1024 * 1024))


def _pick_row_tile(n, hc, heads, vmem_limit):
    # VMEM- and N-aware tile selection instead of a hardcoded 512:
    #   per-step: double-buffered int8 adj tile (2*tq*n) + ~4 live f32 [tq, n]
    #             softmax temporaries (16*tq*n) + a_dst tile + gat scratch;
    #   resident: bf16 xwh + f32 a_src (double-buffered) + score output.
    # Keep >= 2 row tiles so ("parallel",) can shard across TensorCores (v7x).
    resident = 2 * (n * hc * 2 + heads * n * 4) + 8 * n
    budget = int(vmem_limit * 0.6) - resident
    for t in (1024, 512, 256, 128):
        if n % t == 0 and n // t >= 2:
            per_step = 2 * t * n + 16 * t * n + t * (8 * heads + 4 * hc)
            if per_step <= budget:
                return t
    return n   # small graphs: single tile


def sag_pooling(x, edge_index, params, ratio=RATIO):
    N, F = x.shape
    H, C = params["att_dst"].shape
    HC = H * C

    # dense int8 adjacency with self loops (GATConv add_self_loops behaviour)
    # TODO(synk): bit-pack adj (8 edges/byte) for large N to cut the O(N^2) DMA.
    adj = jnp.zeros((N, N), jnp.int8)
    adj = adj.at[edge_index[1], edge_index[0]].set(1)      # row = target, col = source
    adj = adj.at[jnp.arange(N), jnp.arange(N)].set(1)

    # Hoisted node projection + per-head attention logits: computed ONCE in XLA,
    # not once per row tile inside the kernel.
    xw = jnp.dot(x.astype(jnp.float32), params["w"])            # [N, HC] f32
    xwh = jnp.transpose(xw.reshape(N, H, C), (1, 0, 2))         # [H, N, C]
    a_src = jnp.einsum("hnc,hc->hn", xwh, params["att_src"])    # [H, N]
    a_dst = jnp.einsum("hnc,hc->hn", xwh, params["att_dst"])    # [H, N]
    xwh_bf = xwh.astype(jnp.bfloat16)
    asrc_in = a_src[:, None, :]                                 # [H, 1, N]
    adst_in = a_dst[:, :, None]                                 # [H, N, 1]

    # tiny params packed per head: row0 = GAT bias, row1 = lin_w, row2[0,0] = lin_b
    small = jnp.zeros((H, 3, C), jnp.float32)
    small = small.at[:, 0, :].set(params["bias"].reshape(H, C))
    small = small.at[:, 1, :].set(params["lin_w"][:, 0].reshape(H, C))
    small = small.at[0, 2, 0].set(params["lin_b"][0, 0])

    vmem_limit = _vmem_limit_bytes()
    tq = _pick_row_tile(N, HC, H, vmem_limit)
    grid = (N // tq,)

    score_row = pl.pallas_call(
        sag_score_kernel,
        out_shape=jax.ShapeDtypeStruct((1, N), jnp.float32),
        grid=grid,
        in_specs=[
            pl.BlockSpec((tq, N), lambda i: (i, 0)),           # adj row tile (int8)
            pl.BlockSpec((H, N, C), lambda i: (0, 0, 0)),      # xwh (resident, bf16)
            pl.BlockSpec((H, 1, N), lambda i: (0, 0, 0)),      # a_src (resident)
            pl.BlockSpec((H, tq, 1), lambda i: (0, i, 0)),     # a_dst row tile
            pl.BlockSpec((H, 3, C), lambda i: (0, 0, 0)),      # packed small params
        ],
        out_specs=pl.BlockSpec((1, tq), lambda i: (0, i)),
        scratch_shapes=[pltpu.VMEM((H, tq, C), jnp.float32)],
        compiler_params=pltpu.CompilerParams(
            dimension_semantics=("parallel",),                 # shard row tiles over TCs
            vmem_limit_bytes=vmem_limit,
        ),
    )(adj, xwh_bf, asrc_in, adst_in, small)
    score = score_row[0]                                       # torch.squeeze -> [N]

    # topk: batch = zeros(N) -> single graph, k = ceil(ratio * N)
    # NOTE: bf16 matmuls + approx reciprocal give ~1e-3 relative score error; for
    # near-tied scores the selected node set can differ from an f32 torch reference.
    k = int(math.ceil(ratio * N))
    perm = jnp.argsort(-score)[:k]

    xr = x[perm] * score[perm][:, None]

    # filter_adj: relabel kept nodes, flag edges whose endpoints both survive.
    node_map = jnp.full((N,), -1, jnp.int32).at[perm].set(jnp.arange(k, dtype=jnp.int32))
    row = node_map[edge_index[0]]
    col = node_map[edge_index[1]]
    keep = (row >= 0) & (col >= 0)
    # TODO(synk): dynamic-size compaction of (row, col)[keep] has no static-shape
    # Pallas equivalent; done on host (matches filter_adj output).
    return xr, (row, col, keep), perm


if __name__ == "__main__":
    N, F = 16, 8  # 16 nodes, in_channels = 8

    key = jax.random.PRNGKey(0)
    kx, ks, kd, kp = jax.random.split(key, 4)

    x = jax.random.normal(kx, (N, F), jnp.float32)

    # deterministic random graph (no self loops, no duplicate edges)
    src = np.asarray(jax.random.randint(ks, (60,), 0, N))
    dst = np.asarray(jax.random.randint(kd, (60,), 0, N))
    m = src != dst
    edges = np.unique(np.stack([src[m], dst[m]], axis=1), axis=0)
    edge_index = jnp.asarray(edges.T, dtype=jnp.int32)           # [2, E]

    params = init_params(kp, F)

    out = sag_pooling(x, edge_index, params)
    out = jax.block_until_ready(out)
    xr, (row, col, keep), perm = out

    # host-side compaction (variable-length edge_index, matching filter_adj output)
    row_np, col_np, keep_np = np.asarray(row), np.asarray(col), np.asarray(keep)
    new_edge_index = np.stack([row_np[keep_np], col_np[keep_np]], axis=0)

    assert xr.shape == (int(math.ceil(RATIO * N)), F)
    assert perm.shape == (int(math.ceil(RATIO * N)),)
    assert new_edge_index.shape[0] == 2
    assert bool(jnp.all(jnp.isfinite(xr)))

    print("KERNEL_OK")
</pallas_src>

<mosaic_0001>
module attributes {stable_mosaic.version = 11 : i64} {
  func.func @sag_score_kernel(%arg0: i32, %arg1: memref<16x16xi8, #tpu.memory_space<vmem>>, %arg2: memref<4x16x8xbf16, #tpu.memory_space<vmem>>, %arg3: memref<4x1x16xf32, #tpu.memory_space<vmem>>, %arg4: memref<4x16x1xf32, #tpu.memory_space<vmem>>, %arg5: memref<4x3x8xf32, #tpu.memory_space<vmem>>, %arg6: memref<1x16xf32, #tpu.memory_space<vmem>>, %arg7: memref<4x16x8xf32, #tpu.memory_space<vmem>>) attributes {dimension_semantics = [#tpu.dimension_semantics<parallel>], iteration_bounds = array<i64: 1>, scalar_prefetch = 0 : i64, scratch_operands = 1 : i64, tpu.core_type = #tpu.core_type<tc>, window_params = [{transform_indices = @transform_0, window_bounds = array<i64: 16, 16>}, {pipeline_mode = #tpu.pipeline_mode<synchronous>, transform_indices = @transform_1, window_bounds = array<i64: 4, 16, 8>}, {pipeline_mode = #tpu.pipeline_mode<synchronous>, transform_indices = @transform_2, window_bounds = array<i64: 4, 1, 16>}, {transform_indices = @transform_3, window_bounds = array<i64: 4, 16, 1>}, {pipeline_mode = #tpu.pipeline_mode<synchronous>, transform_indices = @transform_4, window_bounds = array<i64: 4, 3, 8>}, {transform_indices = @transform_5, window_bounds = array<i64: 1, 16>}]} {
    %c0 = arith.constant 0 : index
    %c0_0 = arith.constant 0 : index
    %0 = vector.load %arg1[%c0, %c0_0] : memref<16x16xi8, #tpu.memory_space<vmem>>, vector<16x16xi8>
    %c0_i8 = arith.constant 0 : i8
    %1 = vector.broadcast %c0_i8 : i8 to vector<16x16xi8>
    %2 = arith.cmpi ne, %0, %1 : vector<16x16xi8>
    %cst = arith.constant -1.000000e+30 : f32
    %c0_i32 = arith.constant 0 : i32
    %c4_i32 = arith.constant 4 : i32
    %3 = arith.addi %c0_i32, %c4_i32 : i32
    %c1_i32 = arith.constant 1 : i32
    scf.for %arg8 = %c0_i32 to %3 step %c1_i32  : i32 {
      %29 = arith.index_cast %arg8 : i32 to index
      %c0_15 = arith.constant 0 : index
      %c0_16 = arith.constant 0 : index
      %30 = vector.load %arg4[%29, %c0_15, %c0_16] : memref<4x16x1xf32, #tpu.memory_space<vmem>>, vector<1x16x1xf32>
      %31 = vector.shape_cast %30 : vector<1x16x1xf32> to vector<16x1xf32>
      %32 = arith.index_cast %arg8 : i32 to index
      %c0_17 = arith.constant 0 : index
      %c0_18 = arith.constant 0 : index
      %33 = vector.load %arg3[%32, %c0_17, %c0_18] : memref<4x1x16xf32, #tpu.memory_space<vmem>>, vector<1x1x16xf32>
      %34 = vector.shape_cast %33 : vector<1x1x16xf32> to vector<1x16xf32>
      %35 = vector.broadcast %31 : vector<16x1xf32> to vector<16x16xf32>
      %36 = vector.broadcast %34 : vector<1x16xf32> to vector<16x16xf32>
      %37 = arith.addf %35, %36 : vector<16x16xf32>
      %cst_19 = arith.constant 0.000000e+00 : f32
      %38 = vector.broadcast %cst_19 : f32 to vector<16x16xf32>
      %39 = arith.cmpf ogt, %37, %38 : vector<16x16xf32>
      %cst_20 = arith.constant 2.000000e-01 : f32
      %40 = vector.broadcast %cst_20 : f32 to vector<16x16xf32>
      %41 = arith.mulf %40, %37 : vector<16x16xf32>
      %42 = arith.select %39, %37, %41 : vector<16x16xi1>, vector<16x16xf32>
      %43 = vector.broadcast %cst : f32 to vector<16x16xf32>
      %44 = arith.select %2, %42, %43 : vector<16x16xi1>, vector<16x16xf32>
      %cst_21 = arith.constant dense<0xFF800000> : vector<16xf32>
      %45 = vector.multi_reduction <maximumf>, %44, %cst_21 [1] : vector<16x16xf32> to vector<16xf32>
      %46 = vector.shape_cast %45 : vector<16xf32> to vector<16x1xf32>
      %47 = vector.broadcast %46 : vector<16x1xf32> to vector<16x16xf32>
      %48 = arith.subf %44, %47 : vector<16x16xf32>
      %49 = math.exp %48 : vector<16x16xf32>
      %cst_22 = arith.constant dense<0.000000e+00> : vector<16xf32>
      %50 = vector.multi_reduction <add>, %49, %cst_22 [1] : vector<16x16xf32> to vector<16xf32>
      %51 = vector.shape_cast %50 : vector<16xf32> to vector<16x1xf32>
      %52 = arith.truncf %49 : vector<16x16xf32> to vector<16x16xbf16>
      %53 = arith.index_cast %arg8 : i32 to index
      %c0_23 = arith.constant 0 : index
      %c0_24 = arith.constant 0 : index
      %54 = vector.load %arg2[%53, %c0_23, %c0_24] : memref<4x16x8xbf16, #tpu.memory_space<vmem>>, vector<1x16x8xbf16>
      %55 = vector.shape_cast %54 : vector<1x16x8xbf16> to vector<16x8xbf16>
      %cst_25 = arith.constant dense<0.000000e+00> : vector<16x8xf32>
      %56 = tpu.matmul %52, %55, %cst_25 {dimension_numbers = #tpu.dot_dimension_numbers<[1], [0], [0], [1], [0, 0, 1, 1], [], []>} : vector<16x16xbf16>, vector<16x8xbf16>, vector<16x8xf32> -> vector<16x8xf32>
      %57 = tpu.reciprocal %51 {approx = true} : vector<16x1xf32> -> vector<16x1xf32>
      %58 = vector.broadcast %57 : vector<16x1xf32> to vector<16x8xf32>
      %59 = arith.mulf %56, %58 : vector<16x8xf32>
      %60 = arith.index_cast %arg8 : i32 to index
      %c0_26 = arith.constant 0 : index
      %c0_27 = arith.constant 0 : index
      %61 = vector.load %arg7[%60, %c0_26, %c0_27] : memref<4x16x8xf32, #tpu.memory_space<vmem>>, vector<1x16x8xf32>
      %62 = vector.shape_cast %61 : vector<1x16x8xf32> to vector<16x8xf32>
      %63 = vector.shape_cast %59 : vector<16x8xf32> to vector<1x16x8xf32>
      tpu.vector_store %arg7[%60, %c0_26, %c0_27], %63 {strides = array<i32>} : memref<4x16x8xf32, #tpu.memory_space<vmem>>, vector<1x16x8xf32>,
    }
    %c4_i32_1 = arith.constant 4 : i32
    %c0_2 = arith.constant 0 : index
    %c0_3 = arith.constant 0 : index
    %c0_4 = arith.constant 0 : index
    %4 = vector.load %arg5[%c0_2, %c0_3, %c0_4] : memref<4x3x8xf32, #tpu.memory_space<vmem>>, vector<4x3x8xf32>
    %5 = vector.extract_strided_slice %4 {offsets = [0, 0, 0], sizes = [4, 1, 8], strides = [1, 1, 1]} : vector<4x3x8xf32> to vector<4x1x8xf32>
    %6 = vector.extract_strided_slice %4 {offsets = [0, 1, 0], sizes = [4, 1, 8], strides = [1, 1, 1]} : vector<4x3x8xf32> to vector<4x1x8xf32>
    %7 = vector.extract_strided_slice %4 {offsets = [0, 2, 0], sizes = [4, 1, 8], strides = [1, 1, 1]} : vector<4x3x8xf32> to vector<4x1x8xf32>
    %c0_5 = arith.constant 0 : index
    %c0_6 = arith.constant 0 : index
    %c0_7 = arith.constant 0 : index
    %8 = vector.load %arg7[%c0_5, %c0_6, %c0_7] : memref<4x16x8xf32, #tpu.memory_space<vmem>>, vector<4x16x8xf32>
    %9 = vector.broadcast %5 : vector<4x1x8xf32> to vector<4x16x8xf32>
    %10 = arith.addf %8, %9 : vector<4x16x8xf32>
    %cst_8 = arith.constant 0.000000e+00 : f32
    %11 = vector.broadcast %cst_8 : f32 to vector<4x16x8xf32>
    %12 = arith.cmpf ogt, %10, %11 : vector<4x16x8xf32>
    %cst_9 = arith.constant 0.000000e+00 : f32
    %13 = vector.broadcast %cst_9 : f32 to vector<4x16x8xf32>
    %14 = arith.minimumf %10, %13 : vector<4x16x8xf32>
    %15 = math.exp %14 : vector<4x16x8xf32>
    %cst_10 = arith.constant 1.000000e+00 : f32
    %16 = vector.broadcast %cst_10 : f32 to vector<4x16x8xf32>
    %17 = arith.subf %15, %16 : vector<4x16x8xf32>
    %18 = arith.select %12, %10, %17 : vector<4x16x8xi1>, vector<4x16x8xf32>
    %19 = vector.broadcast %6 : vector<4x1x8xf32> to vector<4x16x8xf32>
    %20 = arith.mulf %18, %19 : vector<4x16x8xf32>
    %21 = vector.broadcast %7 : vector<4x1x8xf32> to vector<4x16x8xf32>
    %22 = arith.addf %20, %21 : vector<4x16x8xf32>
    %cst_11 = arith.constant dense<0.000000e+00> : vector<4x16xf32>
    %23 = vector.multi_reduction <add>, %22, %cst_11 [2] : vector<4x16x8xf32> to vector<4x16xf32>
    %24 = vector.shape_cast %23 : vector<4x16xf32> to vector<4x16x1xf32>
    %cst_12 = arith.constant dense<0.000000e+00> : vector<16x1xf32>
    %25 = vector.multi_reduction <add>, %24, %cst_12 [0] : vector<4x16x1xf32> to vector<16x1xf32>
    %26 = math.tanh %25 : vector<16x1xf32>
    %27 = tpu.transpose %26, [1, 0] : vector<16x1xf32> -> vector<1x16xf32>
    %c0_13 = arith.constant 0 : index
    %c0_14 = arith.constant 0 : index
    %28 = vector.load %arg6[%c0_13, %c0_14] : memref<1x16xf32, #tpu.memory_space<vmem>>, vector<1x16xf32>
    tpu.vector_store %arg6[%c0_13, %c0_14], %27 {strides = array<i32>} : memref<1x16xf32, #tpu.memory_space<vmem>>, vector<1x16xf32>,
    return
  }
  func.func @transform_0(%arg0: i32) -> (i32, i32) {
    %c0_i32 = arith.constant 0 : i32
    %c0_i32_0 = arith.constant 0 : i32
    return %arg0, %c0_i32 : i32, i32
  }
  func.func @transform_1(%arg0: i32) -> (i32, i32, i32) {
    %c0_i32 = arith.constant 0 : i32
    %c0_i32_0 = arith.constant 0 : i32
    %c0_i32_1 = arith.constant 0 : i32
    %c0_i32_2 = arith.constant 0 : i32
    return %c0_i32, %c0_i32_0, %c0_i32_1 : i32, i32, i32
  }
  func.func @transform_2(%arg0: i32) -> (i32, i32, i32) {
    %c0_i32 = arith.constant 0 : i32
    %c0_i32_0 = arith.constant 0 : i32
    %c0_i32_1 = arith.constant 0 : i32
    %c0_i32_2 = arith.constant 0 : i32
    return %c0_i32, %c0_i32_0, %c0_i32_1 : i32, i32, i32
  }
  func.func @transform_3(%arg0: i32) -> (i32, i32, i32) {
    %c0_i32 = arith.constant 0 : i32
    %c0_i32_0 = arith.constant 0 : i32
    %c0_i32_1 = arith.constant 0 : i32
    return %c0_i32, %arg0, %c0_i32_0 : i32, i32, i32
  }
  func.func @transform_4(%arg0: i32) -> (i32, i32, i32) {
    %c0_i32 = arith.constant 0 : i32
    %c0_i32_0 = arith.constant 0 : i32
    %c0_i32_1 = arith.constant 0 : i32
    %c0_i32_2 = arith.constant 0 : i32
    return %c0_i32, %c0_i32_0, %c0_i32_1 : i32, i32, i32
  }
  func.func @transform_5(%arg0: i32) -> (i32, i32) {
    %c0_i32 = arith.constant 0 : i32
    %c0_i32_0 = arith.constant 0 : i32
    return %c0_i32, %arg0 : i32, i32
  }
}

</mosaic_0001>

<bundles_post_ra>
// kernel: tpu_custom_call.1
= control target key start
LH: loop header
LB: loop body
LE: loop exit
PB: predicated region body
PF: predicated region fallthrough
CT: control target
= control target key end

     0   :  { %10 = vsyncpa [#allocation4], 0  ;;  %s453_s22 = smov 0   ;;  %s561_s0 = inlined_call_operand.vmem [shape: s8[16,16], index: 0, kind: input, shape index: {}]   ;;  %s562_s1 = inlined_call_operand.vmem [shape: bf16[4,16,8], index: 1, kind: input, shape index: {}]   ;;  %s563_s2 = inlined_call_operand.vmem [shape: f32[4,1,16], index: 2, kind: input, shape index: {}]   ;;  %s564_s3 = inlined_call_operand.vmem [shape: f32[4,16,1], index: 3, kind: input, shape index: {}]   ;;  %s565_s4 = inlined_call_operand.vmem [shape: f32[4,3,8], index: 4, kind: input, shape index: {}]   ;;  %s566_s5 = inlined_call_operand.hbm [shape: f32[1,16], index: 5, kind: output, shape index: {}]  }
   0x1   :  { %v444_v0 = vld [vmem:[%s561_s0] sm:$0x3]  ;;  %v449_v1 = vld [vmem:[%s561_s0 + $0x2] sm:$0x3] }
   0x2   :  { %vm26_vm0 = vnez %v444_v0  ;;  %vm27_vm1 = vnez %v449_v1 }
   0x3 LB: > { %v409_v2 = vmov 0   ;;  %s316_s23 = sshll.u32 %s407_s22, 4  ;;  %s38_s25 = scalar_lea.vmem %s563_s2, %s407_s22  ;;  %vm69_vm4 = vcmask 130048   ;;  %vm122_vm7 = vcmask 64512   ;;  %s407_s22 = sphi %s453_s22, %s33_s22  }
   0x4   : > { %345 = vset.pattern.permute.xlu0 %v409_v2  ;;  %s35_s28 = scalar_lea.vmem %s564_s3, %s316_s23  ;;  %v61_v5 = vsel %vm26_vm0, 16843009, %v409_v2  ;;  %v346_v6 = vld [vmem:[%s38_s25] ss:$0 sm:$0xff]  ;;  %v62_v11 = vsel %vm27_vm1, 16843009, %v409_v2 }
   0x5   : > { %v36_v3 = vld [vmem:[%s35_s28] sm:$0xff]  ;;  %v37_v4 = vld [vmem:[%s35_s28 + $0x8] sm:$0xff]  ;;  %v63_v7 = vunpack.c.0.s8 %v61_v5  ;;  %v64_v15 = vunpack.c.0.s8 %v62_v11  ;;  %s332_s29 = sshll.u32 %s407_s22, 3  ;;  %s121_s8 = scalar_lea.vmem [#allocation2], %s316_s23 }
   0x6   : > { %42 = vperm.xlu0 %345, %v36_v3   ;;  %s91_s7 = scalar_lea.vmem %s562_s1, %s332_s29  ;;  %s33_s22 = sadd.s32 1, %s407_s22  }
   0x7   : > { %vm65_vm3 = vcmp.ne.s32.totalorder %v63_v7, 0  ;;  %vm66_vm6 = vcmp.ne.s32.totalorder %v64_v15, 0  ;;  %v333_v22 = vld [vmem:[%s91_s7] sm:$0xff]  ;;  %p30_p0 = scmp.ge.s32.totalorder %s33_s22, 4  }
   0x8   : > { %110 = vmatpush.bf16.msra.mxu0 %v333_v22  ;;  %v491_v42 = vld [vmem:[%s565_s4 + $0x8] sm:$0x7] (%p30_p0)  ;;  %v496_v44 = vld [vmem:[%s565_s4] sm:$0x7] (%p30_p0)  ;;  %v503_v48 = vld [vmem:[%s565_s4 + $0x4] sm:$0x7] (%p30_p0) }
   0x9   :  { %v139_v45 = vperm.slane (%p30_p0), %v491_v42, 0  ;;  %v137_v47 = vperm.slane (%p30_p0), %v496_v44, 0  ;;  %v138_v53 = vperm.slane (%p30_p0), %v503_v48, 0  ;;  %v509_v55 = vld [vmem:[%s565_s4 + $0xc] sm:$0x7] (%p30_p0)  ;;  %v199_v15 = vperm.slane (%p30_p0), %v491_v42, 1 }
   0xa   :  { %v140_v58 = vperm.slane (%p30_p0), %v509_v55, 0  ;;  %v198_v22 = vperm.slane (%p30_p0), %v503_v48, 1  ;;  %s410_s3 = smov (%p30_p0), [#allocation3]   ;;  %s295_s17 = sshll.u32 (%p30_p0), %s566_s5, 4  ;;  %vm286_vm0 = vcmask (%p30_p0), 122880   ;;  %s296_s17 = int_to_ptr.hbm [resolvable:$true] %s295_s17 }
   0xb   :  { %s293_s4 = sshll.u32 (%p30_p0), %s410_s3, 4  ;;  %s294_s4 = int_to_ptr.vmem [resolvable:$true] %s293_s4 }
   0xe   : > { %47 = vperm.xlu0 %345, %v37_v4  }
  0x78   : > { %v43_v8 = vpop.permute.xlu0 %42 }
  0x79   : > { %v53_v9 = vadd.f32 %v346_v6, %v43_v8 }
  0x7b   : > { %v57_v10 = vmul.f32 0.2, %v53_v9  ;;  %vm55_vm2 = vcmp.gt.f32.partialorder %v53_v9, 0.0 }
  0x7d   : > { %v59_v12 = vsel %vm55_vm2, %v53_v9, %v57_v10 }
  0x7e   : > { %v67_v13 = vsel %vm65_vm3, %v59_v12, -1e+30 }
  0x7f   : > { %v70_v14 = vsel %vm69_vm4, %v67_v13, -inf }
  0x80   : > { %71 = vmax.xlane.f32.xlu1 %v70_v14  ;;  %v48_v16 = vpop.permute.xlu0 %47 }
  0x81   : > { %v54_v17 = vadd.f32 %v346_v6, %v48_v16 }
  0x83   : > { %v58_v18 = vmul.f32 0.2, %v54_v17  ;;  %vm56_vm5 = vcmp.gt.f32.partialorder %v54_v17, 0.0 }
  0x85   : > { %v60_v19 = vsel %vm56_vm5, %v54_v17, %v58_v18  ;;  %v211_v17 = vperm.slane (%p30_p0), %v491_v42, 2  ;;  %v197_v18 = vperm.slane (%p30_p0), %v496_v44, 1 }
  0x86   : > { %v68_v20 = vsel %vm66_vm6, %v60_v19, -1e+30 }
  0x87   : > { %v73_v21 = vsel %vm69_vm4, %v68_v20, -inf }
  0x88   : > { %74 = vmax.xlane.f32.xlu1 %v73_v21  ;;  %v209_v21 = vperm.slane (%p30_p0), %v496_v44, 2 }
  0xf3   : > { %v72_v23 = vpop.xlane.xlu1 %71 }
  0xf4   : > { %v76_v24 = vsub.f32 %v67_v13, %v72_v23 }
  0xf6   : > { %v78_v25 = vmul.f32 1.442695, %v76_v24 }
  0xf8   : > { %347 = vpow2.f32 %v78_v25 }
  0xfb   : > { %v75_v26 = vpop.xlane.xlu1 %74 }
  0xfc   : > { %v77_v27 = vsub.f32 %v68_v20, %v75_v26  ;;  %v210_v26 = vperm.slane (%p30_p0), %v503_v48, 2 }
  0xfe   : > { %v348_v28 = vpop.eup %347  ;;  %v80_v29 = vmul.f32 1.442695, %v77_v27 }
  0xff   : > { %v82_v30 = vsel %vm69_vm4, %v348_v28, 0.0 }
 0x100   : > { %349 = vpow2.f32 %v80_v29  ;;  %83 = vadd.xlane.f32.xlu2 %v82_v30  ;;  %v200_v29 = vperm.slane (%p30_p0), %v509_v55, 1 }
 0x106   : > { %v350_v31 = vpop.eup %349 }
 0x107   : > { %v85_v32 = vsel %vm69_vm4, %v350_v31, 0.0  ;;  %v88_v33 = vpack.c.bf16 %v350_v31, %v348_v28 }
 0x108   : > { %86 = vadd.xlane.f32.xlu2 %v85_v32 }
 0x109   : > { %323 = vmatmul.msk.bf16.vlgmr.msra.gmra.mxu0 %vm69_vm4, %v88_v33  ;;  %v212_v33 = vperm.slane (%p30_p0), %v509_v55, 2 }
 0x173   : > { %v84_v34 = vpop.xlane.xlu2 %83 }
 0x174   : > { %351 = vrcp.f32 %v84_v34 }
 0x17a   : > { %v352_v36 = vpop.eup %351 }
 0x17b   : > { %v87_v35 = vpop.xlane.xlu2 %86 }
 0x17c   : > { %353 = vrcp.f32 %v87_v35 }
 0x182   : > { %v354_v39 = vpop.eup %353 }
 0x186   : > { %v112_v37 = vpop.f32.mrf.mxu0 }
 0x187   : > { %v119_v38 = vmul.f32 %v352_v36, %v112_v37 }
 0x189   : > { %123 = vst.msk [vmem:[%s121_s8] sm:$0xff] %vm122_vm7, %v119_v38 }
 0x18d   :  { %32 = sbr.rel (!%p30_p0) target bundleno = 3 (0x3), region = 51 }
 0x18e   : > { %v114_v40 = vpop.f32.mrf.mxu0 }
 0x18f   : > { %v120_v41 = vmul.f32 %v354_v39, %v114_v40 }
 0x191   : > { %124 = vst.msk [vmem:[%s121_s8 + $0x8] sm:$0xff] %vm122_vm7, %v120_v41 }
 0x198   :  { %v133_v43 = vld [vmem:[#allocation2 + $0x20] sm:$0xff]  ;;  %v130_v49 = vld [vmem:[#allocation2 + $0x8] sm:$0xff]  ;;  %v132_v52 = vld [vmem:[#allocation2 + $0x18] sm:$0xff] }
 0x199   :  { %v129_v46 = vld [vmem:[#allocation2] sm:$0xff]  ;;  %v145_v50 = vadd.f32 %v139_v45, %v133_v43  ;;  %v131_v54 = vld [vmem:[#allocation2 + $0x10] sm:$0xff]  ;;  %v142_v56 = vadd.f32 %v137_v47, %v130_v49  ;;  %v144_v61 = vadd.f32 %v138_v53, %v132_v52  ;;  %v134_v3 = vld [vmem:[#allocation2 + $0x28] sm:$0xff] }
 0x19a   :  { %v141_v51 = vadd.f32 %v137_v47, %v129_v46  ;;  %v135_v57 = vld [vmem:[#allocation2 + $0x30] sm:$0xff]  ;;  %v512_v63 = vadd.f32 %v138_v53, %v131_v54  ;;  %v136_v4 = vld [vmem:[#allocation2 + $0x38] sm:$0xff]  ;;  %v518_v10 = vadd.f32 %v139_v45, %v134_v3 }
 0x19b   :  { %v161_v59 = vmin.f32 %v145_v50, 0.0  ;;  %v158_v62 = vmin.f32 %v142_v56, 0.0  ;;  %v514_v2 = vadd.f32 %v140_v58, %v135_v57  ;;  %v160_v5 = vmin.f32 %v144_v61, 0.0 }
 0x19c   :  { %v157_v60 = vmin.f32 %v141_v51, 0.0  ;;  %v159_v7 = vmin.f32 %v512_v63, 0.0  ;;  %v520_v11 = vadd.f32 %v140_v58, %v136_v4  ;;  %v162_v14 = vmin.f32 %v518_v10, 0.0 }
 0x19d   :  { %v173_v0 = vmul.f32 1.442695, %v161_v59  ;;  %v167_v6 = vmul.f32 1.442695, %v158_v62  ;;  %v163_v8 = vmin.f32 %v514_v2, 0.0  ;;  %vm153_vm8 = vcmp.gt.f32.partialorder %v145_v50, 0.0 }
 0x19e   :  { %v165_v1 = vmul.f32 1.442695, %v157_v60  ;;  %v171_v9 = vmul.f32 1.442695, %v160_v5  ;;  %v169_v12 = vmul.f32 1.442695, %v159_v7 }
 0x19f   :  { %355 = vpow2.f32 %v173_v0  ;;  %v177_v13 = vmul.f32 1.442695, %v163_v8  ;;  %v164_v16 = vmin.f32 %v520_v11, 0.0  ;;  %v175_v19 = vmul.f32 1.442695, %v162_v14 }
 0x1a0   :  { %357 = vpow2.f32 %v165_v1  ;;  %vm149_vm9 = vcmp.gt.f32.partialorder %v141_v51, 0.0  ;;  %vm150_vm10 = vcmp.gt.f32.partialorder %v142_v56, 0.0  ;;  %vm152_vm11 = vcmp.gt.f32.partialorder %v144_v61, 0.0 }
 0x1a1   :  { %359 = vpow2.f32 %v167_v6  ;;  %v179_v23 = vmul.f32 1.442695, %v164_v16  ;;  %vm151_vm12 = vcmp.gt.f32.partialorder %v512_v63, 0.0  ;;  %vm155_vm13 = vcmp.gt.f32.partialorder %v514_v2, 0.0 }
 0x1a2   :  { %361 = vpow2.f32 %v171_v9  ;;  %vm154_vm14 = vcmp.gt.f32.partialorder %v518_v10, 0.0  ;;  %vm156_vm15 = vcmp.gt.f32.partialorder %v520_v11, 0.0 }
 0x1a3   :  { %363 = vpow2.f32 %v169_v12 }
 0x1a4   :  { %365 = vpow2.f32 %v177_v13 }
 0x1a5   :  { %v356_v20 = vpop.eup %355  ;;  %367 = vpow2.f32 %v175_v19 }
 0x1a6   :  { %v358_v24 = vpop.eup %357  ;;  %v328_v25 = vadd.f32 -1.0, %v356_v20  ;;  %369 = vpow2.f32 %v179_v23 }
 0x1a7   :  { %v360_v27 = vpop.eup %359  ;;  %v324_v28 = vadd.f32 -1.0, %v358_v24 }
 0x1a8   :  { %v362_v30 = vpop.eup %361  ;;  %v193_v31 = vsel %vm153_vm8, %v145_v50, %v328_v25  ;;  %v325_v32 = vadd.f32 -1.0, %v360_v27 }
 0x1a9   :  { %v364_v34 = vpop.eup %363  ;;  %v205_v35 = vmul.f32 %v199_v15, %v193_v31  ;;  %v189_v36 = vsel %vm149_vm9, %v141_v51, %v324_v28  ;;  %v327_v37 = vadd.f32 -1.0, %v362_v30 }
 0x1aa   :  { %v366_v38 = vpop.eup %365  ;;  %v201_v39 = vmul.f32 %v197_v18, %v189_v36  ;;  %v190_v40 = vsel %vm150_vm10, %v142_v56, %v325_v32  ;;  %v326_v41 = vadd.f32 -1.0, %v364_v34 }
 0x1ab   :  { %v217_v43 = vadd.f32 %v211_v17, %v205_v35  ;;  %v192_v44 = vsel %vm152_vm11, %v144_v61, %v327_v37  ;;  %v202_v45 = vmul.f32 %v197_v18, %v190_v40  ;;  %v330_v46 = vadd.f32 -1.0, %v366_v38  ;;  %v368_v47 = vpop.eup %367 }
 0x1ac   :  { %v213_v48 = vadd.f32 %v209_v21, %v201_v39  ;;  %v204_v49 = vmul.f32 %v198_v22, %v192_v44  ;;  %v191_v50 = vsel %vm151_vm12, %v512_v63, %v326_v41  ;;  %v370_v51 = vpop.eup %369  ;;  %v329_v58 = vadd.f32 -1.0, %v368_v47 }
 0x1ad   :  { %v234_v52 = vsel %vm122_vm7, %v217_v43, 0.0  ;;  %v203_v53 = vmul.f32 %v198_v22, %v191_v50  ;;  %v195_v54 = vsel %vm155_vm13, %v514_v2, %v330_v46  ;;  %v214_v59 = vadd.f32 %v209_v21, %v202_v45 }
 0x1ae   :  { %235 = vadd.xlane.f32.xlu1 %v234_v52  ;;  %v222_v55 = vsel %vm122_vm7, %v213_v48, 0.0  ;;  %v216_v56 = vadd.f32 %v210_v26, %v204_v49  ;;  %v207_v57 = vmul.f32 %v200_v29, %v195_v54  ;;  %v331_v60 = vadd.f32 -1.0, %v370_v51 }
 0x1af   :  { %223 = vadd.xlane.f32.xlu0 %v222_v55  ;;  %v215_v62 = vadd.f32 %v210_v26, %v203_v53  ;;  %v194_v63 = vsel %vm154_vm14, %v518_v10, %v329_v58  ;;  %v225_v2 = vsel %vm122_vm7, %v214_v59, 0.0 }
 0x1b0   :  { %v231_v61 = vsel %vm122_vm7, %v216_v56, 0.0  ;;  %v196_v0 = vsel %vm156_vm15, %v520_v11, %v331_v60  ;;  %v219_v1 = vadd.f32 %v212_v33, %v207_v57  ;;  %v206_v5 = vmul.f32 %v199_v15, %v194_v63 }
 0x1b1   :  { %232 = vadd.xlane.f32.xlu2 %v231_v61  ;;  %v208_v3 = vmul.f32 %v200_v29, %v196_v0  ;;  %v228_v4 = vsel %vm122_vm7, %v215_v62, 0.0 }
 0x1b2   :  { %v240_v6 = vsel %vm122_vm7, %v219_v1, 0.0  ;;  %v218_v8 = vadd.f32 %v211_v17, %v206_v5 }
 0x1b3   :  { %v220_v7 = vadd.f32 %v212_v33, %v208_v3 }
 0x1b4   :  { %v237_v10 = vsel %vm122_vm7, %v218_v8, 0.0 }
 0x1b5   :  { %v243_v9 = vsel %vm122_vm7, %v220_v7, 0.0 }
 0x1b6   :  { %226 = vadd.xlane.f32.xlu1 %v225_v2 }
 0x1b7   :  { %229 = vadd.xlane.f32.xlu0 %v228_v4 }
 0x1b9   :  { %241 = vadd.xlane.f32.xlu2 %v240_v6 }
 0x1be   :  { %244 = vadd.xlane.f32.xlu1 %v243_v9 }
 0x1bf   :  { %238 = vadd.xlane.f32.xlu0 %v237_v10 }
 0x221   :  { %v236_v11 = vpop.xlane.xlu1 %235 }
 0x222   :  { %v224_v12 = vpop.xlane.xlu0 %223 }
 0x224   :  { %v233_v13 = vpop.xlane.xlu2 %232 }
 0x229   :  { %v227_v14 = vpop.xlane.xlu1 %226 }
 0x22a   :  { %v230_v15 = vpop.xlane.xlu0 %229  ;;  %v249_v21 = vadd.f32 %v233_v13, %v227_v14 }
 0x22b   :  { %v246_v16 = vadd.f32 %v230_v15, %v224_v12 }
 0x22c   :  { %v242_v18 = vpop.xlane.xlu2 %241 }
 0x22d   :  { %v247_v19 = vadd.f32 %v246_v16, %v236_v11 }
 0x22f   :  { %v248_v20 = vadd.f32 %v247_v19, %v242_v18 }
 0x231   :  { %371 = vtanh.f32 %v248_v20  ;;  %v245_v17 = vpop.xlane.xlu1 %244 }
 0x232   :  { %v239_v42 = vpop.xlane.xlu0 %238 }
 0x233   :  { %v250_v22 = vadd.f32 %v249_v21, %v239_v42 }
 0x235   :  { %v251_v23 = vadd.f32 %v250_v22, %v245_v17 }
 0x237   :  { %v372_v24 = vpop.eup %371  ;;  %373 = vtanh.f32 %v251_v23 }
 0x238   :  { %254 = vxpose.xlu2.b32.start [1/2] (short) (narrow) %v372_v24, 8 }
 0x23d   :  { %v374_v25 = vpop.eup %373 }
 0x240   :  { %255 = vxpose.xlu2.b32.end [2/2] (short) (narrow) %v374_v25, 8 }
 0x2d1   :  { %v270_v26 = vpop.trf.xlu2 }
 0x2d2   :  { %287 = vst.msk [vmem:[#allocation3] sm:$0x1] %vm286_vm0, %v270_v26 }
 0x2d3   :  { %298 = dma.vmem_to_hbm [thread:$0]  %s294_s4, 16, %s296_s17, [#allocation4]  }
 0x2d4   :  { %403 = dma.done.wait [#allocation4], 16  }
 0x2d5   :  { %404 = vsyncadd [#allocation4], 4294967280 }
 0x2d6   :  { %303 = vsyncpa [#allocation4], 1 }

</bundles_post_ra>
